<compile_context>
chip_gen: v5e
topology: v5e:2x2
jax: 0.10.0
libtpu: 0.0.40
codegen_flags: <defaults>
</compile_context>

<pallas_src>
import jax
import jax.numpy as jnp
from jax import lax
from jax.experimental import pallas as pl
from jax.experimental.pallas import tpu as pltpu

LN_EPS = 1e-5  # nn.LayerNorm default


# ---------------------------------------------------------------------------
# Fused TransformerBlock kernel (one grid step == nb batch elements)
#   q_ref   : (nb*Lq, E)  2-D lane-last activation slab
#   v_ref   : (nb, Lv, E) value block (only its per-batch column-sum is used)
#   w_att   : (E, E)      folded V-proj + fc weight
#   ff1_w   : (E, 2E), ff2_w : (2E, E)
#   vec_ref : (8, 2E) f32 packed vectors:
#             row 0 b_att | 1 ln_g | 2 ln_b | 3 ff2_b | 4 ff1_b (full 2E)
# ---------------------------------------------------------------------------
def transformer_block_kernel(q_ref, v_ref, w_att_ref, ff1_w_ref, ff2_w_ref,
                             vec_ref, out_ref):
    nb, lv, e = v_ref.shape
    m = q_ref.shape[0]
    l = m // nb

    # unpack the consolidated bias / LayerNorm vectors (static slices, free)
    b_att = vec_ref[0:1, :e]
    ln_g = vec_ref[1:2, :e]
    ln_b = vec_ref[2:3, :e]
    ff2_b = vec_ref[3:4, :e]
    ff1_b = vec_ref[4:5, :]

    # ---- MultiheadAttention (exact degenerate-einsum fold) -----------------
    v_col = jnp.sum(v_ref[...].astype(jnp.float32), axis=1)          # (nb, E)
    w_att = w_att_ref[...]
    att = jnp.dot(v_col.astype(w_att.dtype), w_att,
                  preferred_element_type=jnp.float32) + b_att        # (nb, E)

    # ---- residual + LayerNorm (f32 elementwise, one-pass moments) ----------
    q = q_ref[...].astype(jnp.float32)                               # (M, E)
    att_rows = jnp.broadcast_to(att[:, None, :], (nb, l, e)).reshape(m, e)
    h = q + att_rows
    mean = jnp.mean(h, axis=-1, keepdims=True)
    mean_sq = jnp.mean(h * h, axis=-1, keepdims=True)
    var = jnp.maximum(mean_sq - mean * mean, 0.0)
    h = (h - mean) * lax.rsqrt(var + LN_EPS) * ln_g + ln_b
    # dropout(p=0.1) -> identity (eval mode)

    # ---- feed_forward on the flat 2-D slab: Linear -> ReLU -> Linear -------
    w1 = ff1_w_ref[...]
    z = jnp.dot(h.astype(w1.dtype), w1,
                preferred_element_type=jnp.float32) + ff1_b
    z = jnp.maximum(z, 0.0)
    w2 = ff2_w_ref[...]
    out = jnp.dot(z.astype(w2.dtype), w2,
                  preferred_element_type=jnp.float32) + ff2_b
    out_ref[...] = out.astype(out_ref.dtype)    # trailing dropout -> identity


# ---------------------------------------------------------------------------
# Host-side helpers
# ---------------------------------------------------------------------------
def _padded_bytes(shape, itemsize):
    shape = tuple(int(d) for d in shape)
    if len(shape) == 1:
        shape = (1,) + shape
    lead = shape[:-2]
    sub = -(-shape[-2] // 8) * 8
    lane = -(-shape[-1] // 128) * 128
    total = itemsize * sub * lane
    for d in lead:
        total *= d
    return total


def _vmem_estimate(nb, lq, lv, e, act_bytes, w_bytes, out_bytes, w_bufs=2):
    io = 2 * (_padded_bytes((nb * lq, e), act_bytes)          # double-buffered
              + _padded_bytes((nb, lv, e), act_bytes)
              + _padded_bytes((nb * lq, e), out_bytes))
    weights = w_bufs * (_padded_bytes((e, e), w_bytes)
                        + _padded_bytes((e, 2 * e), w_bytes)
                        + _padded_bytes((2 * e, e), w_bytes)
                        + _padded_bytes((8, 2 * e), 4))
    interm = (4 * _padded_bytes((nb * lq, e), 4)              # f32 temporaries
              + _padded_bytes((nb * lq, 2 * e), 4)
              + _padded_bytes((nb, lv, e), 4))
    return io + weights + interm


def _tpu_generation():
    kind = ""
    try:
        kind = jax.devices()[0].device_kind.lower()
    except Exception:
        pass
    is_v7 = "v7" in kind
    vmem_cap = 0
    try:
        vmem_cap = int(pltpu.get_tpu_info().vmem_capacity_bytes)
    except Exception:
        vmem_cap = 0
    if vmem_cap <= 0:
        vmem_cap = (64 if is_v7 else 128) * 1024 * 1024
    return is_v7, vmem_cap


def _pick_nb(n, lq, lv, e, act_bytes, w_bytes, out_bytes,
             min_grid_steps, vmem_budget, target_rows=256):
    # Only a full (n*Lq, E) row block satisfies the (8,128) rule if Lq % 8 != 0.
    if lq % 8 != 0:
        return n

    def fits(nb):
        return _vmem_estimate(nb, lq, lv, e, act_bytes, w_bytes,
                              out_bytes) <= 0.8 * vmem_budget

    divisors = [d for d in range(n, 0, -1) if n % d == 0]
    feasible = [d for d in divisors if fits(d)] or [1]
    stepped = [d for d in feasible if n // d >= min_grid_steps] or feasible
    reaching = [d for d in stepped if d * lq >= target_rows]
    return min(reaching) if reaching else max(stepped)


def _weight_spec(shape, single_buffer):
    nd = len(shape)
    kwargs = {}
    if single_buffer and hasattr(pl, "Buffered"):
        # constant index_map -> block never re-fetched; 1 buffer halves VMEM.
        kwargs["pipeline_mode"] = pl.Buffered(1)
    return pl.BlockSpec(shape, lambda i, _nd=nd: (0,) * _nd, **kwargs)


# ---------------------------------------------------------------------------
# Wrapper
# ---------------------------------------------------------------------------
def transformer_block_pallas(query, key, value, mask, params, num_head,
                             matmul_dtype=jnp.float32, act_dtype=None,
                             out_dtype=None, nb=None):
    # `key` / `mask` provably do not affect the reference output (see header),
    # so they are never DMA'd into the kernel.
    del key, mask
    n, lq, e = query.shape
    lv = value.shape[1]
    h = num_head
    p = params

    act_dtype = matmul_dtype if act_dtype is None else act_dtype
    out_dtype = query.dtype if out_dtype is None else out_dtype

    # ---- one-time weight prep: fold V-projection + fc of the MHA ----------
    vw_t = p["att_vw"].T.astype(jnp.float32)                          # (D, D)
    fcw_t = p["att_fcw"].T.astype(jnp.float32)                        # (E, E)
    w_att = jnp.kron(jnp.eye(h, dtype=jnp.float32), vw_t) @ fcw_t     # (E, E)
    b_att = (float(lv) * jnp.tile(p["att_vb"].astype(jnp.float32), h)) @ fcw_t \
        + p["att_fcb"].astype(jnp.float32)                            # (E,)
    ff1_w = p["ff1_w"].T.astype(jnp.float32)                          # (E, 2E)
    ff2_w = p["ff2_w"].T.astype(jnp.float32)                          # (2E, E)

    # consolidated small vectors -> one (8, 2E) f32 block (one DMA, one tile)
    vec = jnp.zeros((8, 2 * e), jnp.float32)
    vec = vec.at[0, :e].set(b_att)
    vec = vec.at[1, :e].set(p["ln1_g"].astype(jnp.float32))
    vec = vec.at[2, :e].set(p["ln1_b"].astype(jnp.float32))
    vec = vec.at[3, :e].set(p["ff2_b"].astype(jnp.float32))
    vec = vec.at[4, :].set(p["ff1_b"].astype(jnp.float32))

    # MXU operands in matmul_dtype (bf16 works on v5e/v6e/v7x); f32 accumulate.
    w_att = w_att.astype(matmul_dtype)
    ff1_w = ff1_w.astype(matmul_dtype)
    ff2_w = ff2_w.astype(matmul_dtype)

    # Activations: 2-D lane-last slab; bf16 halves the per-step HBM traffic.
    q2d = query.reshape(n * lq, e).astype(act_dtype)
    val = value.astype(act_dtype)

    # ---- generation-aware tiling & VMEM budget ------------------------------
    is_v7, vmem_cap = _tpu_generation()
    budget = int(0.85 * vmem_cap)          # ~56 MiB on v7x, ~110 MiB on v5e/v6e
    min_steps = 2 if is_v7 else 1          # 2 TCs on v7x; serial grid otherwise
    act_b = jnp.dtype(act_dtype).itemsize
    w_b = jnp.dtype(matmul_dtype).itemsize
    out_b = jnp.dtype(out_dtype).itemsize
    if nb is None:
        nb = _pick_nb(n, lq, lv, e, act_b, w_b, out_b, min_steps, budget)
    est = _vmem_estimate(nb, lq, lv, e, act_b, w_b, out_b)
    vmem_limit = int(min(budget, max(32 * 1024 * 1024, 1.5 * est)))

    # NOTE: at production E, additionally K-tile ff1_w/ff2_w over the 2E dim
    # (trailing 'arbitrary' grid axis + f32 VMEM accumulator, pattern P3).
    def build(single_buffer_weights):
        in_specs = [
            pl.BlockSpec((nb * lq, e), lambda i: (i, 0)),      # query slab
            pl.BlockSpec((nb, lv, e), lambda i: (i, 0, 0)),    # value block
            _weight_spec((e, e), single_buffer_weights),       # w_att
            _weight_spec((e, 2 * e), single_buffer_weights),   # ff1_w
            _weight_spec((2 * e, e), single_buffer_weights),   # ff2_w
            _weight_spec((8, 2 * e), single_buffer_weights),   # packed vectors
        ]
        grid_spec = pltpu.PrefetchScalarGridSpec(
            num_scalar_prefetch=0,
            grid=(n // nb,),
            in_specs=in_specs,
            out_specs=pl.BlockSpec((nb * lq, e), lambda i: (i, 0)),
        )
        return pl.pallas_call(
            transformer_block_kernel,
            out_shape=jax.ShapeDtypeStruct((n * lq, e), out_dtype),
            grid_spec=grid_spec,
            compiler_params=pltpu.CompilerParams(
                dimension_semantics=("parallel",),
                vmem_limit_bytes=vmem_limit),
        )

    args = (q2d, val, w_att, ff1_w, ff2_w, vec)
    try:
        out2d = build(True)(*args)
    except Exception:
        # pipeline_mode=pl.Buffered(1) unsupported on this jax/Mosaic build:
        # fall back to default double-buffered weight blocks (same semantics).
        out2d = build(False)(*args)
    return out2d.reshape(n, lq, e)


# ---------------------------------------------------------------------------
# Pure-JAX reference (literal transcription of the PyTorch code, eval mode)
# ---------------------------------------------------------------------------
def _mha_ref(query, key, value, mask, p, num_head, e):
    n, lq, _ = query.shape
    lk, lv = key.shape[1], value.shape[1]
    d = e // num_head
    q = query.reshape(n, lq, num_head, d) @ p["att_qw"].T + p["att_qb"]
    k = key.reshape(n, lk, num_head, d) @ p["att_kw"].T + p["att_kb"]
    v = value.reshape(n, lv, num_head, d) @ p["att_vw"].T + p["att_vb"]
    energy = jnp.einsum("nqhd,nkhd->nhqk", q, k)
    energy = jnp.where(mask[:, None, :, :] == 0, -1e20, energy)
    attn = jax.nn.softmax(energy / (e ** 0.5), axis=3)
    out = jnp.einsum("nhqk,nvhd->nqhd", attn, v).reshape(n, lq, e)
    return out @ p["att_fcw"].T + p["att_fcb"]


def _ln_ref(x, g, b):
    mean = jnp.mean(x, axis=-1, keepdims=True)
    var = jnp.mean((x - mean) ** 2, axis=-1, keepdims=True)
    return (x - mean) / jnp.sqrt(var + LN_EPS) * g + b


def transformer_block_ref(query, key, value, mask, p, num_head):
    e = query.shape[-1]
    att = _mha_ref(query, key, value, mask, p, num_head, e)
    x = _ln_ref(query + att, p["ln1_g"], p["ln1_b"])       # dropout -> identity
    x = jnp.maximum(x @ p["ff1_w"].T + p["ff1_b"], 0.0)
    x = x @ p["ff2_w"].T + p["ff2_b"]
    return x                                                # dropout -> identity


# ---------------------------------------------------------------------------
# Main
# ---------------------------------------------------------------------------
if __name__ == "__main__":
    # Toy demo shape: E=32 uses only 32/128 lanes and K=32 matmuls; production
    # should use E as a multiple of 128 (ideally 256 on v6e/v7x).
    N, L, E, H = 2, 8, 32, 4
    D = E // H

    root = jax.random.PRNGKey(0)
    keys = iter(jax.random.split(root, 64))

    def nrm(shape, scale=0.1):
        return (scale * jax.random.normal(next(keys), shape)).astype(jnp.float32)

    params = {
        "att_qw": nrm((D, D)), "att_qb": nrm((D,)),
        "att_kw": nrm((D, D)), "att_kb": nrm((D,)),
        "att_vw": nrm((D, D)), "att_vb": nrm((D,)),
        "att_fcw": nrm((E, E)), "att_fcb": nrm((E,)),
        "ln1_g": 1.0 + nrm((E,)), "ln1_b": nrm((E,)),
        "ff1_w": nrm((2 * E, E)), "ff1_b": nrm((2 * E,)),
        "ff2_w": nrm((E, 2 * E)), "ff2_b": nrm((E,)),
    }

    query = nrm((N, L, E), scale=1.0)
    key_in = nrm((N, L, E), scale=1.0)
    value = nrm((N, L, E), scale=1.0)
    # causal mask: the reference applies it, but (degenerate einsum) it has no
    # effect on the output — the kernel never touches it.
    mask = jnp.broadcast_to(jnp.tril(jnp.ones((L, L), jnp.float32)), (N, L, L))

    ref = transformer_block_ref(query, key_in, value, mask, params, H)

    # f32 path: strict check.
    out = transformer_block_pallas(query, key_in, value, mask, params, H)
    out = jax.block_until_ready(out)
    assert out.shape == (N, L, E)
    assert jnp.allclose(out, ref, atol=1e-4, rtol=1e-4), (
        f"f32 max err {jnp.max(jnp.abs(out - ref))}")

    # bf16 weights + bf16 activation I/O (all generations): loose check.
    out_bf16 = transformer_block_pallas(query, key_in, value, mask, params, H,
                                        matmul_dtype=jnp.bfloat16)
    out_bf16 = jax.block_until_ready(out_bf16)
    assert jnp.all(jnp.isfinite(out_bf16))
    assert jnp.allclose(out_bf16, ref, atol=5e-2, rtol=5e-2), (
        f"bf16 max err {jnp.max(jnp.abs(out_bf16 - ref))}")

    print("KERNEL_OK")
</pallas_src>

<mosaic_0001>
module attributes {stable_mosaic.version = 11 : i64} {
  func.func @transformer_block_kernel(%arg0: i32, %arg1: memref<16x32xf32, #tpu.memory_space<vmem>>, %arg2: memref<2x8x32xf32, #tpu.memory_space<vmem>>, %arg3: memref<32x32xf32, #tpu.memory_space<vmem>>, %arg4: memref<32x64xf32, #tpu.memory_space<vmem>>, %arg5: memref<64x32xf32, #tpu.memory_space<vmem>>, %arg6: memref<8x64xf32, #tpu.memory_space<vmem>>, %arg7: memref<16x32xf32, #tpu.memory_space<vmem>>) attributes {dimension_semantics = [#tpu.dimension_semantics<parallel>], iteration_bounds = array<i64: 1>, scalar_prefetch = 0 : i64, scratch_operands = 0 : i64, tpu.core_type = #tpu.core_type<tc>, window_params = [{transform_indices = @transform_0, window_bounds = array<i64: 16, 32>}, {transform_indices = @transform_1, window_bounds = array<i64: 2, 8, 32>}, {pipeline_mode = #tpu.pipeline_mode<synchronous>, transform_indices = @transform_2, window_bounds = array<i64: 32, 32>}, {pipeline_mode = #tpu.pipeline_mode<synchronous>, transform_indices = @transform_3, window_bounds = array<i64: 32, 64>}, {pipeline_mode = #tpu.pipeline_mode<synchronous>, transform_indices = @transform_4, window_bounds = array<i64: 64, 32>}, {pipeline_mode = #tpu.pipeline_mode<synchronous>, transform_indices = @transform_5, window_bounds = array<i64: 8, 64>}, {transform_indices = @transform_6, window_bounds = array<i64: 16, 32>}]} {
    %c0 = arith.constant 0 : index
    %c0_0 = arith.constant 0 : index
    %0 = vector.load %arg6[%c0, %c0_0] : memref<8x64xf32, #tpu.memory_space<vmem>>, vector<1x32xf32>
    %c1 = arith.constant 1 : index
    %c0_1 = arith.constant 0 : index
    %1 = vector.load %arg6[%c1, %c0_1] : memref<8x64xf32, #tpu.memory_space<vmem>>, vector<1x32xf32>
    %c2 = arith.constant 2 : index
    %c0_2 = arith.constant 0 : index
    %2 = vector.load %arg6[%c2, %c0_2] : memref<8x64xf32, #tpu.memory_space<vmem>>, vector<1x32xf32>
    %c3 = arith.constant 3 : index
    %c0_3 = arith.constant 0 : index
    %3 = vector.load %arg6[%c3, %c0_3] : memref<8x64xf32, #tpu.memory_space<vmem>>, vector<1x32xf32>
    %c4 = arith.constant 4 : index
    %c0_4 = arith.constant 0 : index
    %4 = vector.load %arg6[%c4, %c0_4] : memref<8x64xf32, #tpu.memory_space<vmem>>, vector<1x64xf32>
    %c0_5 = arith.constant 0 : index
    %c0_6 = arith.constant 0 : index
    %c0_7 = arith.constant 0 : index
    %5 = vector.load %arg2[%c0_5, %c0_6, %c0_7] : memref<2x8x32xf32, #tpu.memory_space<vmem>>, vector<2x8x32xf32>
    %cst = arith.constant dense<0.000000e+00> : vector<2x32xf32>
    %6 = vector.multi_reduction <add>, %5, %cst [1] : vector<2x8x32xf32> to vector<2x32xf32>
    %c0_8 = arith.constant 0 : index
    %c0_9 = arith.constant 0 : index
    %7 = vector.load %arg3[%c0_8, %c0_9] : memref<32x32xf32, #tpu.memory_space<vmem>>, vector<32x32xf32>
    %cst_10 = arith.constant dense<0.000000e+00> : vector<2x32xf32>
    %8 = tpu.matmul %6, %7, %cst_10 {dimension_numbers = #tpu.dot_dimension_numbers<[1], [0], [0], [1], [0, 0, 1, 1], [], []>} : vector<2x32xf32>, vector<32x32xf32>, vector<2x32xf32> -> vector<2x32xf32>
    %9 = vector.broadcast %0 : vector<1x32xf32> to vector<2x32xf32>
    %10 = arith.addf %8, %9 : vector<2x32xf32>
    %c0_11 = arith.constant 0 : index
    %c0_12 = arith.constant 0 : index
    %11 = vector.load %arg1[%c0_11, %c0_12] : memref<16x32xf32, #tpu.memory_space<vmem>>, vector<16x32xf32>
    %12 = vector.shape_cast %10 : vector<2x32xf32> to vector<2x1x32xf32>
    %13 = vector.shape_cast %12 : vector<2x1x32xf32> to vector<2x1x32xf32>
    %14 = vector.broadcast %13 : vector<2x1x32xf32> to vector<2x8x32xf32>
    %15 = vector.shape_cast %14 : vector<2x8x32xf32> to vector<16x32xf32>
    %16 = arith.addf %11, %15 : vector<16x32xf32>
    %cst_13 = arith.constant dense<0.000000e+00> : vector<16xf32>
    %17 = vector.multi_reduction <add>, %16, %cst_13 [1] : vector<16x32xf32> to vector<16xf32>
    %18 = vector.shape_cast %17 : vector<16xf32> to vector<16x1xf32>
    %cst_14 = arith.constant 3.200000e+01 : f32
    %19 = vector.broadcast %cst_14 : f32 to vector<16x1xf32>
    %20 = arith.divf %18, %19 : vector<16x1xf32>
    %21 = arith.mulf %16, %16 : vector<16x32xf32>
    %cst_15 = arith.constant dense<0.000000e+00> : vector<16xf32>
    %22 = vector.multi_reduction <add>, %21, %cst_15 [1] : vector<16x32xf32> to vector<16xf32>
    %23 = vector.shape_cast %22 : vector<16xf32> to vector<16x1xf32>
    %cst_16 = arith.constant 3.200000e+01 : f32
    %24 = vector.broadcast %cst_16 : f32 to vector<16x1xf32>
    %25 = arith.divf %23, %24 : vector<16x1xf32>
    %26 = arith.mulf %20, %20 : vector<16x1xf32>
    %27 = arith.subf %25, %26 : vector<16x1xf32>
    %cst_17 = arith.constant 0.000000e+00 : f32
    %28 = vector.broadcast %cst_17 : f32 to vector<16x1xf32>
    %29 = arith.maximumf %27, %28 : vector<16x1xf32>
    %30 = vector.broadcast %20 : vector<16x1xf32> to vector<16x32xf32>
    %31 = arith.subf %16, %30 : vector<16x32xf32>
    %cst_18 = arith.constant 9.99999974E-6 : f32
    %32 = vector.broadcast %cst_18 : f32 to vector<16x1xf32>
    %33 = arith.addf %29, %32 : vector<16x1xf32>
    %34 = math.rsqrt %33 : vector<16x1xf32>
    %35 = vector.broadcast %34 : vector<16x1xf32> to vector<16x32xf32>
    %36 = arith.mulf %31, %35 : vector<16x32xf32>
    %37 = vector.broadcast %1 : vector<1x32xf32> to vector<16x32xf32>
    %38 = arith.mulf %36, %37 : vector<16x32xf32>
    %39 = vector.broadcast %2 : vector<1x32xf32> to vector<16x32xf32>
    %40 = arith.addf %38, %39 : vector<16x32xf32>
    %c0_19 = arith.constant 0 : index
    %c0_20 = arith.constant 0 : index
    %41 = vector.load %arg4[%c0_19, %c0_20] : memref<32x64xf32, #tpu.memory_space<vmem>>, vector<32x64xf32>
    %cst_21 = arith.constant dense<0.000000e+00> : vector<16x64xf32>
    %42 = tpu.matmul %40, %41, %cst_21 {dimension_numbers = #tpu.dot_dimension_numbers<[1], [0], [0], [1], [0, 0, 1, 1], [], []>} : vector<16x32xf32>, vector<32x64xf32>, vector<16x64xf32> -> vector<16x64xf32>
    %43 = vector.broadcast %4 : vector<1x64xf32> to vector<16x64xf32>
    %44 = arith.addf %42, %43 : vector<16x64xf32>
    %cst_22 = arith.constant 0.000000e+00 : f32
    %45 = vector.broadcast %cst_22 : f32 to vector<16x64xf32>
    %46 = arith.maximumf %44, %45 : vector<16x64xf32>
    %c0_23 = arith.constant 0 : index
    %c0_24 = arith.constant 0 : index
    %47 = vector.load %arg5[%c0_23, %c0_24] : memref<64x32xf32, #tpu.memory_space<vmem>>, vector<64x32xf32>
    %cst_25 = arith.constant dense<0.000000e+00> : vector<16x32xf32>
    %48 = tpu.matmul %46, %47, %cst_25 {dimension_numbers = #tpu.dot_dimension_numbers<[1], [0], [0], [1], [0, 0, 1, 1], [], []>} : vector<16x64xf32>, vector<64x32xf32>, vector<16x32xf32> -> vector<16x32xf32>
    %49 = vector.broadcast %3 : vector<1x32xf32> to vector<16x32xf32>
    %50 = arith.addf %48, %49 : vector<16x32xf32>
    %c0_26 = arith.constant 0 : index
    %c0_27 = arith.constant 0 : index
    %51 = vector.load %arg7[%c0_26, %c0_27] : memref<16x32xf32, #tpu.memory_space<vmem>>, vector<16x32xf32>
    tpu.vector_store %arg7[%c0_26, %c0_27], %50 {strides = array<i32>} : memref<16x32xf32, #tpu.memory_space<vmem>>, vector<16x32xf32>,
    return
  }
  func.func @transform_0(%arg0: i32) -> (i32, i32) {
    %c0_i32 = arith.constant 0 : i32
    %c0_i32_0 = arith.constant 0 : i32
    return %arg0, %c0_i32 : i32, i32
  }
  func.func @transform_1(%arg0: i32) -> (i32, i32, i32) {
    %c0_i32 = arith.constant 0 : i32
    %c0_i32_0 = arith.constant 0 : i32
    %c0_i32_1 = arith.constant 0 : i32
    return %arg0, %c0_i32, %c0_i32_0 : i32, i32, i32
  }
  func.func @transform_2(%arg0: i32) -> (i32, i32) {
    %c0_i32 = arith.constant 0 : i32
    %c0_i32_0 = arith.constant 0 : i32
    %c0_i32_1 = arith.constant 0 : i32
    return %c0_i32, %c0_i32_0 : i32, i32
  }
  func.func @transform_3(%arg0: i32) -> (i32, i32) {
    %c0_i32 = arith.constant 0 : i32
    %c0_i32_0 = arith.constant 0 : i32
    %c0_i32_1 = arith.constant 0 : i32
    return %c0_i32, %c0_i32_0 : i32, i32
  }
  func.func @transform_4(%arg0: i32) -> (i32, i32) {
    %c0_i32 = arith.constant 0 : i32
    %c0_i32_0 = arith.constant 0 : i32
    %c0_i32_1 = arith.constant 0 : i32
    return %c0_i32, %c0_i32_0 : i32, i32
  }
  func.func @transform_5(%arg0: i32) -> (i32, i32) {
    %c0_i32 = arith.constant 0 : i32
    %c0_i32_0 = arith.constant 0 : i32
    %c0_i32_1 = arith.constant 0 : i32
    return %c0_i32, %c0_i32_0 : i32, i32
  }
  func.func @transform_6(%arg0: i32) -> (i32, i32) {
    %c0_i32 = arith.constant 0 : i32
    %c0_i32_0 = arith.constant 0 : i32
    return %arg0, %c0_i32 : i32, i32
  }
}

module attributes {stable_mosaic.version = 11 : i64} {
  func.func @transformer_block_kernel(%arg0: i32, %arg1: memref<16x32xf32, #tpu.memory_space<vmem>>, %arg2: memref<2x8x32xf32, #tpu.memory_space<vmem>>, %arg3: memref<32x32xf32, #tpu.memory_space<vmem>>, %arg4: memref<32x64xf32, #tpu.memory_space<vmem>>, %arg5: memref<64x32xf32, #tpu.memory_space<vmem>>, %arg6: memref<8x64xf32, #tpu.memory_space<vmem>>, %arg7: memref<16x32xf32, #tpu.memory_space<vmem>>) attributes {dimension_semantics = [#tpu.dimension_semantics<parallel>], iteration_bounds = array<i64: 1>, scalar_prefetch = 0 : i64, scratch_operands = 0 : i64, tpu.core_type = #tpu.core_type<tc>, window_params = [{transform_indices = @transform_0, window_bounds = array<i64: 16, 32>}, {transform_indices = @transform_1, window_bounds = array<i64: 2, 8, 32>}, {pipeline_mode = #tpu.pipeline_mode<synchronous>, transform_indices = @transform_2, window_bounds = array<i64: 32, 32>}, {pipeline_mode = #tpu.pipeline_mode<synchronous>, transform_indices = @transform_3, window_bounds = array<i64: 32, 64>}, {pipeline_mode = #tpu.pipeline_mode<synchronous>, transform_indices = @transform_4, window_bounds = array<i64: 64, 32>}, {pipeline_mode = #tpu.pipeline_mode<synchronous>, transform_indices = @transform_5, window_bounds = array<i64: 8, 64>}, {transform_indices = @transform_6, window_bounds = array<i64: 16, 32>}]} {
    %c0 = arith.constant 0 : index
    %c0_0 = arith.constant 0 : index
    %0 = vector.load %arg6[%c0, %c0_0] : memref<8x64xf32, #tpu.memory_space<vmem>>, vector<1x32xf32>
    %c1 = arith.constant 1 : index
    %c0_1 = arith.constant 0 : index
    %1 = vector.load %arg6[%c1, %c0_1] : memref<8x64xf32, #tpu.memory_space<vmem>>, vector<1x32xf32>
    %c2 = arith.constant 2 : index
    %c0_2 = arith.constant 0 : index
    %2 = vector.load %arg6[%c2, %c0_2] : memref<8x64xf32, #tpu.memory_space<vmem>>, vector<1x32xf32>
    %c3 = arith.constant 3 : index
    %c0_3 = arith.constant 0 : index
    %3 = vector.load %arg6[%c3, %c0_3] : memref<8x64xf32, #tpu.memory_space<vmem>>, vector<1x32xf32>
    %c4 = arith.constant 4 : index
    %c0_4 = arith.constant 0 : index
    %4 = vector.load %arg6[%c4, %c0_4] : memref<8x64xf32, #tpu.memory_space<vmem>>, vector<1x64xf32>
    %c0_5 = arith.constant 0 : index
    %c0_6 = arith.constant 0 : index
    %c0_7 = arith.constant 0 : index
    %5 = vector.load %arg2[%c0_5, %c0_6, %c0_7] : memref<2x8x32xf32, #tpu.memory_space<vmem>>, vector<2x8x32xf32>
    %cst = arith.constant dense<0.000000e+00> : vector<2x32xf32>
    %6 = vector.multi_reduction <add>, %5, %cst [1] : vector<2x8x32xf32> to vector<2x32xf32>
    %c0_8 = arith.constant 0 : index
    %c0_9 = arith.constant 0 : index
    %7 = vector.load %arg3[%c0_8, %c0_9] : memref<32x32xf32, #tpu.memory_space<vmem>>, vector<32x32xf32>
    %cst_10 = arith.constant dense<0.000000e+00> : vector<2x32xf32>
    %8 = tpu.matmul %6, %7, %cst_10 {dimension_numbers = #tpu.dot_dimension_numbers<[1], [0], [0], [1], [0, 0, 1, 1], [], []>} : vector<2x32xf32>, vector<32x32xf32>, vector<2x32xf32> -> vector<2x32xf32>
    %9 = vector.broadcast %0 : vector<1x32xf32> to vector<2x32xf32>
    %10 = arith.addf %8, %9 : vector<2x32xf32>
    %c0_11 = arith.constant 0 : index
    %c0_12 = arith.constant 0 : index
    %11 = vector.load %arg1[%c0_11, %c0_12] : memref<16x32xf32, #tpu.memory_space<vmem>>, vector<16x32xf32>
    %12 = vector.shape_cast %10 : vector<2x32xf32> to vector<2x1x32xf32>
    %13 = vector.shape_cast %12 : vector<2x1x32xf32> to vector<2x1x32xf32>
    %14 = vector.broadcast %13 : vector<2x1x32xf32> to vector<2x8x32xf32>
    %15 = vector.shape_cast %14 : vector<2x8x32xf32> to vector<16x32xf32>
    %16 = arith.addf %11, %15 : vector<16x32xf32>
    %cst_13 = arith.constant dense<0.000000e+00> : vector<16xf32>
    %17 = vector.multi_reduction <add>, %16, %cst_13 [1] : vector<16x32xf32> to vector<16xf32>
    %18 = vector.shape_cast %17 : vector<16xf32> to vector<16x1xf32>
    %cst_14 = arith.constant 3.200000e+01 : f32
    %19 = vector.broadcast %cst_14 : f32 to vector<16x1xf32>
    %20 = arith.divf %18, %19 : vector<16x1xf32>
    %21 = arith.mulf %16, %16 : vector<16x32xf32>
    %cst_15 = arith.constant dense<0.000000e+00> : vector<16xf32>
    %22 = vector.multi_reduction <add>, %21, %cst_15 [1] : vector<16x32xf32> to vector<16xf32>
    %23 = vector.shape_cast %22 : vector<16xf32> to vector<16x1xf32>
    %cst_16 = arith.constant 3.200000e+01 : f32
    %24 = vector.broadcast %cst_16 : f32 to vector<16x1xf32>
    %25 = arith.divf %23, %24 : vector<16x1xf32>
    %26 = arith.mulf %20, %20 : vector<16x1xf32>
    %27 = arith.subf %25, %26 : vector<16x1xf32>
    %cst_17 = arith.constant 0.000000e+00 : f32
    %28 = vector.broadcast %cst_17 : f32 to vector<16x1xf32>
    %29 = arith.maximumf %27, %28 : vector<16x1xf32>
    %30 = vector.broadcast %20 : vector<16x1xf32> to vector<16x32xf32>
    %31 = arith.subf %16, %30 : vector<16x32xf32>
    %cst_18 = arith.constant 9.99999974E-6 : f32
    %32 = vector.broadcast %cst_18 : f32 to vector<16x1xf32>
    %33 = arith.addf %29, %32 : vector<16x1xf32>
    %34 = math.rsqrt %33 : vector<16x1xf32>
    %35 = vector.broadcast %34 : vector<16x1xf32> to vector<16x32xf32>
    %36 = arith.mulf %31, %35 : vector<16x32xf32>
    %37 = vector.broadcast %1 : vector<1x32xf32> to vector<16x32xf32>
    %38 = arith.mulf %36, %37 : vector<16x32xf32>
    %39 = vector.broadcast %2 : vector<1x32xf32> to vector<16x32xf32>
    %40 = arith.addf %38, %39 : vector<16x32xf32>
    %c0_19 = arith.constant 0 : index
    %c0_20 = arith.constant 0 : index
    %41 = vector.load %arg4[%c0_19, %c0_20] : memref<32x64xf32, #tpu.memory_space<vmem>>, vector<32x64xf32>
    %cst_21 = arith.constant dense<0.000000e+00> : vector<16x64xf32>
    %42 = tpu.matmul %40, %41, %cst_21 {dimension_numbers = #tpu.dot_dimension_numbers<[1], [0], [0], [1], [0, 0, 1, 1], [], []>} : vector<16x32xf32>, vector<32x64xf32>, vector<16x64xf32> -> vector<16x64xf32>
    %43 = vector.broadcast %4 : vector<1x64xf32> to vector<16x64xf32>
    %44 = arith.addf %42, %43 : vector<16x64xf32>
    %cst_22 = arith.constant 0.000000e+00 : f32
    %45 = vector.broadcast %cst_22 : f32 to vector<16x64xf32>
    %46 = arith.maximumf %44, %45 : vector<16x64xf32>
    %c0_23 = arith.constant 0 : index
    %c0_24 = arith.constant 0 : index
    %47 = vector.load %arg5[%c0_23, %c0_24] : memref<64x32xf32, #tpu.memory_space<vmem>>, vector<64x32xf32>
    %cst_25 = arith.constant dense<0.000000e+00> : vector<16x32xf32>
    %48 = tpu.matmul %46, %47, %cst_25 {dimension_numbers = #tpu.dot_dimension_numbers<[1], [0], [0], [1], [0, 0, 1, 1], [], []>} : vector<16x64xf32>, vector<64x32xf32>, vector<16x32xf32> -> vector<16x32xf32>
    %49 = vector.broadcast %3 : vector<1x32xf32> to vector<16x32xf32>
    %50 = arith.addf %48, %49 : vector<16x32xf32>
    %c0_26 = arith.constant 0 : index
    %c0_27 = arith.constant 0 : index
    %51 = vector.load %arg7[%c0_26, %c0_27] : memref<16x32xf32, #tpu.memory_space<vmem>>, vector<16x32xf32>
    tpu.vector_store %arg7[%c0_26, %c0_27], %50 {strides = array<i32>} : memref<16x32xf32, #tpu.memory_space<vmem>>, vector<16x32xf32>,
    return
  }
  func.func @transform_0(%arg0: i32) -> (i32, i32) {
    %c0_i32 = arith.constant 0 : i32
    %c0_i32_0 = arith.constant 0 : i32
    return %arg0, %c0_i32 : i32, i32
  }
  func.func @transform_1(%arg0: i32) -> (i32, i32, i32) {
    %c0_i32 = arith.constant 0 : i32
    %c0_i32_0 = arith.constant 0 : i32
    %c0_i32_1 = arith.constant 0 : i32
    return %arg0, %c0_i32, %c0_i32_0 : i32, i32, i32
  }
  func.func @transform_2(%arg0: i32) -> (i32, i32) {
    %c0_i32 = arith.constant 0 : i32
    %c0_i32_0 = arith.constant 0 : i32
    %c0_i32_1 = arith.constant 0 : i32
    return %c0_i32, %c0_i32_0 : i32, i32
  }
  func.func @transform_3(%arg0: i32) -> (i32, i32) {
    %c0_i32 = arith.constant 0 : i32
    %c0_i32_0 = arith.constant 0 : i32
    %c0_i32_1 = arith.constant 0 : i32
    return %c0_i32, %c0_i32_0 : i32, i32
  }
  func.func @transform_4(%arg0: i32) -> (i32, i32) {
    %c0_i32 = arith.constant 0 : i32
    %c0_i32_0 = arith.constant 0 : i32
    %c0_i32_1 = arith.constant 0 : i32
    return %c0_i32, %c0_i32_0 : i32, i32
  }
  func.func @transform_5(%arg0: i32) -> (i32, i32) {
    %c0_i32 = arith.constant 0 : i32
    %c0_i32_0 = arith.constant 0 : i32
    %c0_i32_1 = arith.constant 0 : i32
    return %c0_i32, %c0_i32_0 : i32, i32
  }
  func.func @transform_6(%arg0: i32) -> (i32, i32) {
    %c0_i32 = arith.constant 0 : i32
    %c0_i32_0 = arith.constant 0 : i32
    return %arg0, %c0_i32 : i32, i32
  }
}

</mosaic_0001>

<bundles_post_ra>
// kernel: tpu_custom_call.1
= control target key start
LH: loop header
LB: loop body
LE: loop exit
PB: predicated region body
PF: predicated region fallthrough
CT: control target
= control target key end

     0   :  { %11 = vsyncpa [#allocation3], 0  ;;  %s470_s0 = inlined_call_operand.vmem [shape: f32[16,32], index: 0, kind: input, shape index: {}]   ;;  %s471_s1 = inlined_call_operand.vmem [shape: f32[2,8,32], index: 1, kind: input, shape index: {}]   ;;  %s472_s2 = inlined_call_operand.vmem [shape: f32[32,32], index: 2, kind: input, shape index: {}]   ;;  %s473_s3 = inlined_call_operand.vmem [shape: f32[32,64], index: 3, kind: input, shape index: {}]   ;;  %s474_s4 = inlined_call_operand.vmem [shape: f32[64,32], index: 4, kind: input, shape index: {}]   ;;  %s475_s5 = inlined_call_operand.hbm [shape: f32[8,64], index: 5, kind: input, shape index: {}]   ;;  %s476_s6 = inlined_call_operand.hbm [shape: f32[16,32], index: 6, kind: output, shape index: {}]  }
   0x1   :  { %12 = vsyncpa [#allocation4], 0  ;;  %s28_s23 = sshll.u32 %s475_s5, 4  ;;  %s341_s24 = smov [#allocation2]   ;;  %s29_s23 = int_to_ptr.hbm [resolvable:$true] %s28_s23 }
   0x2   :  { %s30_s25 = sshll.u32 %s341_s24, 4  ;;  %s31_s25 = int_to_ptr.vmem [resolvable:$true] %s30_s25 }
   0x3   :  { %33 = dma.hbm_to_vmem [thread:$0]  %s29_s23, 128, %s31_s25, [#allocation3]  }
   0x4   :  { %337 = dma.done.wait [#allocation3], 128  }
   0x5   :  { %338 = vsyncadd [#allocation3], 4294967168  ;;  %vm45_vm0 = vcmask 261120   ;;  %v63_v0 = vld [vmem:[%s472_s2 + $0x18] sm:$0xff]  ;;  %v62_v1 = vld [vmem:[%s472_s2 + $0x10] sm:$0xff]  ;;  %vm67_vm1 = vcmask 1041409  }
   0x6   :  { %83 = vmatpush.msra.mxu0 %v63_v0  ;;  %v43_v2 = vld [vmem:[%s471_s1] sm:$0xff]  ;;  %v44_v3 = vld [vmem:[%s471_s1 + $0x8] sm:$0xff]  ;;  %v342_v37 = vmov 32.0   ;;  %v167_v44 = vld [vmem:[%s473_s3 + $0x18] sm:$0xff]  ;;  %vm209_vm9 = vcmask 523264   ;;  %s343_s12 = smov [#allocation5]  }
   0x7   :  { %v61_v4 = vld [vmem:[%s472_s2 + $0x8] sm:$0xff]  ;;  %v46_v5 = vsel %vm45_vm0, %v43_v2, 0.0  ;;  %v53_v6 = vsel %vm45_vm0, %v44_v3, 0.0  ;;  %v60_v9 = vld [vmem:[%s472_s2] sm:$0xff]  ;;  %283 = vrcp.f32 %v342_v37  ;;  %187 = vmatpush.msra.mxu1 %v167_v44  ;;  %v166_v47 = vld [vmem:[%s473_s3 + $0x10] sm:$0xff]  ;;  %s245_s1 = sshll.u32 %s343_s12, 4  ;;  %s246_s1 = int_to_ptr.vmem [resolvable:$true] %s245_s1 }
   0x8   :  { %84 = vmatpush.msra.mxu0 %v62_v1  ;;  %v47_v7 = vrot.slane %v46_v5, 4  ;;  %v54_v8 = vrot.slane %v53_v6, 4  ;;  %v278_v21 = vld [vmem:[#allocation2] ss:$0 sm:$0xff]  ;;  %v92_v27 = vld [vmem:[%s470_s0 + $0x8] sm:$0xff]  ;;  %v207_v0 = vld [vmem:[%s474_s4 + $0x38] sm:$0xff] }
   0x9   :  { %v91_v24 = vld [vmem:[%s470_s0] sm:$0xff]  ;;  %v165_v48 = vld [vmem:[%s473_s3 + $0x8] sm:$0xff]  ;;  %188 = vmatpush.msra.mxu1 %v166_v47  ;;  %v206_v1 = vld [vmem:[%s474_s4 + $0x30] sm:$0xff]  ;;  %224 = vmatpush.msra.mxu2 %v207_v0  ;;  %s247_s13 = sshll.u32 %s476_s6, 4  ;;  %s344_s14 = smov 128   ;;  %s248_s13 = int_to_ptr.hbm [resolvable:$true] %s247_s13 }
   0xa   :  { %85 = vmatpush.msra.mxu0 %v61_v4  ;;  %v48_v10 = vadd.f32 %v47_v7, %v46_v5  ;;  %v55_v11 = vadd.f32 %v54_v8, %v53_v6  ;;  %v164_v50 = vld [vmem:[%s473_s3] sm:$0xff]  ;;  %265 = vmatpush.msra.mxu3 %v207_v0  ;;  %v205_v2 = vld [vmem:[%s474_s4 + $0x28] sm:$0xff]  ;;  %v203_v5 = vld [vmem:[%s474_s4 + $0x18] sm:$0xff]  ;;  %s345_s0 = smov 8  }
   0xb   :  { %189 = vmatpush.msra.mxu1 %v165_v48  ;;  %225 = vmatpush.msra.mxu2 %v206_v1  ;;  %v204_v3 = vld [vmem:[%s474_s4 + $0x20] sm:$0xff] }
   0xc   :  { %86 = vmatpush.msra.mxu0 %v60_v9  ;;  %v49_v12 = vrot.slane %v48_v10, 2  ;;  %v56_v13 = vrot.slane %v55_v11, 2  ;;  %266 = vmatpush.msra.mxu3 %v206_v1 }
   0xd   :  { %v284_v38 = vpop.eup %283  ;;  %190 = vmatpush.msra.mxu1 %v164_v50  ;;  %226 = vmatpush.msra.mxu2 %v205_v2 }
   0xe   :  { %v50_v14 = vadd.f32 %v49_v12, %v48_v10  ;;  %v57_v15 = vadd.f32 %v56_v13, %v55_v11  ;;  %v108_v39 = vmul.f32 32.0, %v284_v38  ;;  %vm112_vm2 = vweird.f32 %v284_v38  ;;  %267 = vmatpush.msra.mxu3 %v205_v2 }
   0xf   :  { %227 = vmatpush.msra.mxu2 %v204_v3 }
  0x10   :  { %v51_v16 = vrot.slane %v50_v14, 1  ;;  %v58_v17 = vrot.slane %v57_v15, 1  ;;  %v109_v40 = vsub.f32 1.0, %v108_v39  ;;  %268 = vmatpush.msra.mxu3 %v204_v3  ;;  %v282_v39 = vld [vmem:[#allocation2 + $0x3] ss:$0 sm:$0xff] }
  0x11   :  { %228 = vmatpush.msra.mxu2 %v203_v5 }
  0x12   :  { %v52_v18 = vadd.f32 %v51_v16, %v50_v14  ;;  %v59_v19 = vadd.f32 %v58_v17, %v57_v15  ;;  %v110_v41 = vmul.f32 %v284_v38, %v109_v40  ;;  %269 = vmatpush.msra.mxu3 %v203_v5  ;;  %v279_v17 = vld [vmem:[#allocation2 + $0x1] ss:$0 sm:$0xff] }
  0x14   :  { %v68_v20 = vsel %vm67_vm1, %v59_v19, %v52_v18  ;;  %v111_v42 = vadd.f32 %v284_v38, %v110_v41 }
  0x15   :  { %260 = vmatmul.msk.f32.vlgmr.msra.gmra.mxu0 %vm45_vm0, %v68_v20 }
  0x16   :  { %v113_v45 = vsel %vm112_vm2, %v284_v38, %v111_v42 }
  0x92   :  { %v88_v22 = vpop.f32.mrf.mxu0 }
  0x93   :  { %v89_v23 = vadd.f32 %v278_v21, %v88_v22  ;;  %v280_v21 = vld [vmem:[#allocation2 + $0x2] ss:$0 sm:$0xff] }
  0x95   :  { %v94_v25 = vrot.slane %v89_v23, 1  ;;  %v95_v26 = vperm.slane %v89_v23, 0 }
  0x97   :  { %v96_v28 = vperm.slane %v94_v25, 0  ;;  %v411_v29 = vadd.f32 %v95_v26, %v91_v24 }
  0x99   :  { %v101_v30 = vsel %vm45_vm0, %v411_v29, 0.0  ;;  %v415_v31 = vadd.f32 %v96_v28, %v92_v27  ;;  %v116_v33 = vmul.f32 %v411_v29, %v411_v29 }
  0x9a   :  { %102 = vadd.xlane.f32.xlu0 %v101_v30  ;;  %v201_v30 = vld [vmem:[%s474_s4 + $0x8] sm:$0xff] }
  0x9b   :  { %v104_v32 = vsel %vm45_vm0, %v415_v31, 0.0  ;;  %v117_v34 = vmul.f32 %v415_v31, %v415_v31  ;;  %v118_v35 = vsel %vm45_vm0, %v116_v33, 0.0 }
  0x9c   :  { %105 = vadd.xlane.f32.xlu1 %v104_v32  ;;  %v281_v32 = vld [vmem:[#allocation2 + $0x4] ss:$0 sm:$0xff] }
  0x9d   :  { %v121_v36 = vsel %vm45_vm0, %v117_v34, 0.0 }
  0xa2   :  { %119 = vadd.xlane.f32.xlu0 %v118_v35 }
  0xa4   :  { %122 = vadd.xlane.f32.xlu1 %v121_v36 }
 0x10d   :  { %v103_v43 = vpop.xlane.xlu0 %102 }
 0x10e   :  { %v114_v49 = vmul.f32 %v113_v45, %v103_v43 }
 0x10f   :  { %v106_v46 = vpop.xlane.xlu1 %105 }
 0x110   :  { %v115_v51 = vmul.f32 %v113_v45, %v106_v46  ;;  %v126_v53 = vmul.f32 %v114_v49, %v114_v49  ;;  %v132_v16 = vsub.f32 %v411_v29, %v114_v49  ;;  %v202_v29 = vld [vmem:[%s474_s4 + $0x10] sm:$0xff] }
 0x111   :  { %229 = vmatpush.msra.mxu2 %v202_v29  ;;  %270 = vmatpush.msra.mxu3 %v202_v29 }
 0x112   :  { %v127_v56 = vmul.f32 %v115_v51, %v115_v51  ;;  %v133_v23 = vsub.f32 %v415_v31, %v115_v51  ;;  %v200_v31 = vld [vmem:[%s474_s4] sm:$0xff] }
 0x113   :  { %230 = vmatpush.msra.mxu2 %v201_v30  ;;  %271 = vmatpush.msra.mxu3 %v201_v30 }
 0x115   :  { %v120_v52 = vpop.xlane.xlu0 %119  ;;  %231 = vmatpush.msra.mxu2 %v200_v31  ;;  %272 = vmatpush.msra.mxu3 %v200_v31 }
 0x116   :  { %v124_v54 = vmul.f32 %v120_v52, %v113_v45 }
 0x117   :  { %v123_v55 = vpop.xlane.xlu1 %122 }
 0x118   :  { %v128_v57 = vsub.f32 %v124_v54, %v126_v53  ;;  %v125_v58 = vmul.f32 %v123_v55, %v113_v45 }
 0x11a   :  { %v130_v59 = vmax.f32 %v128_v57, 0.0  ;;  %v129_v60 = vsub.f32 %v125_v58, %v127_v56 }
 0x11c   :  { %v134_v61 = vadd.f32 1e-05, %v130_v59  ;;  %v131_v62 = vmax.f32 %v129_v60, 0.0 }
 0x11e   :  { %285 = vrsqrt.f32 %v134_v61  ;;  %v135_v63 = vadd.f32 1e-05, %v131_v62  ;;  %vm142_vm4 = vweird.f32 %v134_v61 }
 0x120   :  { %287 = vrsqrt.f32 %v135_v63  ;;  %vm152_vm7 = vweird.f32 %v135_v63 }
 0x124   :  { %v286_v4 = vpop.eup %285 }
 0x125   :  { %v137_v6 = vmul.f32 %v286_v4, %v134_v61  ;;  %vm143_vm3 = vweird.f32 %v286_v4 }
 0x126   :  { %v288_v7 = vpop.eup %287  ;;  %vm144_vm6 = vmor %vm142_vm4, %vm143_vm3 }
 0x127   :  { %v138_v8 = vmul.f32 %v286_v4, %v137_v6  ;;  %v147_v9 = vmul.f32 %v288_v7, %v135_v63  ;;  %vm153_vm5 = vweird.f32 %v288_v7 }
 0x128   :  { %vm154_vm8 = vmor %vm152_vm7, %vm153_vm5 }
 0x129   :  { %v139_v10 = vmul.f32 0.5, %v138_v8  ;;  %v148_v11 = vmul.f32 %v288_v7, %v147_v9 }
 0x12b   :  { %v140_v12 = vsub.f32 1.5, %v139_v10  ;;  %v149_v13 = vmul.f32 0.5, %v148_v11 }
 0x12d   :  { %v141_v14 = vmul.f32 %v286_v4, %v140_v12  ;;  %v150_v15 = vsub.f32 1.5, %v149_v13 }
 0x12f   :  { %v151_v18 = vmul.f32 %v288_v7, %v150_v15  ;;  %v145_v19 = vsel %vm144_vm6, %v286_v4, %v141_v14 }
 0x130   :  { %v156_v20 = vmul.f32 %v145_v19, %v132_v16 }
 0x131   :  { %v155_v22 = vsel %vm154_vm8, %v288_v7, %v151_v18 }
 0x132   :  { %v159_v24 = vmul.f32 %v279_v17, %v156_v20  ;;  %v157_v26 = vmul.f32 %v155_v22, %v133_v23 }
 0x134   :  { %v162_v25 = vadd.f32 %v280_v21, %v159_v24  ;;  %v160_v27 = vmul.f32 %v279_v17, %v157_v26 }
 0x136   :  { %261 = vmatmul.msk.f32.vlgmr.msra.gmra.mxu1 %vm45_vm0, %v162_v25  ;;  %v163_v28 = vadd.f32 %v280_v21, %v160_v27 }
 0x13e   :  { %262 = vmatmul.msk.f32.gmra.mxu1 %vm45_vm0, %v163_v28 }
 0x1b3   :  { %v192_v33 = vpop.f32.mrf.mxu1 }
 0x1b4   :  { %v193_v34 = vadd.f32 %v281_v32, %v192_v33 }
 0x1b6   :  { %v198_v35 = vmax.f32 %v193_v34, 0.0 }
 0x1b8   :  { %263 = vmatmul.msk.f32.vlgmr.msra.gmra.mxu2 %vm209_vm9, %v198_v35 }
 0x1bb   :  { %v195_v36 = vpop.f32.mrf.mxu1 }
 0x1bc   :  { %v196_v37 = vadd.f32 %v281_v32, %v195_v36 }
 0x1be   :  { %v199_v38 = vmax.f32 %v196_v37, 0.0 }
 0x1c0   :  { %264 = vmatmul.msk.f32.vlgmr.msra.gmra.mxu3 %vm209_vm9, %v199_v38 }
 0x23b   :  { %v233_v40 = vpop.f32.mrf.mxu2 }
 0x23c   :  { %v234_v41 = vadd.f32 %v282_v39, %v233_v40 }
 0x23e   :  { %239 = vst.msk [vmem:[#allocation5] sm:$0xff] %vm45_vm0, %v234_v41 }
 0x243   :  { %v236_v42 = vpop.f32.mrf.mxu3 }
 0x244   :  { %v237_v43 = vadd.f32 %v282_v39, %v236_v42 }
 0x246   :  { %240 = vst.msk [vmem:[#allocation5 + $0x8] sm:$0xff] %vm45_vm0, %v237_v43 }
 0x247   :  { %253 = dma.vmem_to_hbm [thread:$0]  %s246_s1, 256, %s248_s13, [#allocation4], %s344_s14, %s344_s14, %s345_s0  }
 0x248   :  { %339 = dma.done.wait [#allocation4], 256  }
 0x249   :  { %340 = vsyncadd [#allocation4], 4294967040 }
 0x24a   :  { %258 = vsyncpa [#allocation3], 1 }
 0x24b   :  { %259 = vsyncpa [#allocation4], 1 }

// kernel: tpu_custom_call.1
= control target key start
LH: loop header
LB: loop body
LE: loop exit
PB: predicated region body
PF: predicated region fallthrough
CT: control target
= control target key end

     0   :  { %11 = vsyncpa [#allocation3], 0  ;;  %s470_s0 = inlined_call_operand.vmem [shape: f32[16,32], index: 0, kind: input, shape index: {}]   ;;  %s471_s1 = inlined_call_operand.vmem [shape: f32[2,8,32], index: 1, kind: input, shape index: {}]   ;;  %s472_s2 = inlined_call_operand.vmem [shape: f32[32,32], index: 2, kind: input, shape index: {}]   ;;  %s473_s3 = inlined_call_operand.vmem [shape: f32[32,64], index: 3, kind: input, shape index: {}]   ;;  %s474_s4 = inlined_call_operand.vmem [shape: f32[64,32], index: 4, kind: input, shape index: {}]   ;;  %s475_s5 = inlined_call_operand.hbm [shape: f32[8,64], index: 5, kind: input, shape index: {}]   ;;  %s476_s6 = inlined_call_operand.hbm [shape: f32[16,32], index: 6, kind: output, shape index: {}]  }
   0x1   :  { %12 = vsyncpa [#allocation4], 0  ;;  %s28_s23 = sshll.u32 %s475_s5, 4  ;;  %s341_s24 = smov [#allocation2]   ;;  %s29_s23 = int_to_ptr.hbm [resolvable:$true] %s28_s23 }
   0x2   :  { %s30_s25 = sshll.u32 %s341_s24, 4  ;;  %s31_s25 = int_to_ptr.vmem [resolvable:$true] %s30_s25 }
   0x3   :  { %33 = dma.hbm_to_vmem [thread:$0]  %s29_s23, 128, %s31_s25, [#allocation3]  }
   0x4   :  { %337 = dma.done.wait [#allocation3], 128  }
   0x5   :  { %338 = vsyncadd [#allocation3], 4294967168  ;;  %vm45_vm0 = vcmask 261120   ;;  %v63_v0 = vld [vmem:[%s472_s2 + $0x18] sm:$0xff]  ;;  %v62_v1 = vld [vmem:[%s472_s2 + $0x10] sm:$0xff]  ;;  %vm67_vm1 = vcmask 1041409  }
   0x6   :  { %83 = vmatpush.msra.mxu0 %v63_v0  ;;  %v43_v2 = vld [vmem:[%s471_s1] sm:$0xff]  ;;  %v44_v3 = vld [vmem:[%s471_s1 + $0x8] sm:$0xff]  ;;  %v342_v37 = vmov 32.0   ;;  %v167_v44 = vld [vmem:[%s473_s3 + $0x18] sm:$0xff]  ;;  %vm209_vm9 = vcmask 523264   ;;  %s343_s12 = smov [#allocation5]  }
   0x7   :  { %v61_v4 = vld [vmem:[%s472_s2 + $0x8] sm:$0xff]  ;;  %v46_v5 = vsel %vm45_vm0, %v43_v2, 0.0  ;;  %v53_v6 = vsel %vm45_vm0, %v44_v3, 0.0  ;;  %v60_v9 = vld [vmem:[%s472_s2] sm:$0xff]  ;;  %283 = vrcp.f32 %v342_v37  ;;  %187 = vmatpush.msra.mxu1 %v167_v44  ;;  %v166_v47 = vld [vmem:[%s473_s3 + $0x10] sm:$0xff]  ;;  %s245_s1 = sshll.u32 %s343_s12, 4  ;;  %s246_s1 = int_to_ptr.vmem [resolvable:$true] %s245_s1 }
   0x8   :  { %84 = vmatpush.msra.mxu0 %v62_v1  ;;  %v47_v7 = vrot.slane %v46_v5, 4  ;;  %v54_v8 = vrot.slane %v53_v6, 4  ;;  %v278_v21 = vld [vmem:[#allocation2] ss:$0 sm:$0xff]  ;;  %v92_v27 = vld [vmem:[%s470_s0 + $0x8] sm:$0xff]  ;;  %v207_v0 = vld [vmem:[%s474_s4 + $0x38] sm:$0xff] }
   0x9   :  { %v91_v24 = vld [vmem:[%s470_s0] sm:$0xff]  ;;  %v165_v48 = vld [vmem:[%s473_s3 + $0x8] sm:$0xff]  ;;  %188 = vmatpush.msra.mxu1 %v166_v47  ;;  %v206_v1 = vld [vmem:[%s474_s4 + $0x30] sm:$0xff]  ;;  %224 = vmatpush.msra.mxu2 %v207_v0  ;;  %s247_s13 = sshll.u32 %s476_s6, 4  ;;  %s344_s14 = smov 128   ;;  %s248_s13 = int_to_ptr.hbm [resolvable:$true] %s247_s13 }
   0xa   :  { %85 = vmatpush.msra.mxu0 %v61_v4  ;;  %v48_v10 = vadd.f32 %v47_v7, %v46_v5  ;;  %v55_v11 = vadd.f32 %v54_v8, %v53_v6  ;;  %v164_v50 = vld [vmem:[%s473_s3] sm:$0xff]  ;;  %265 = vmatpush.msra.mxu3 %v207_v0  ;;  %v205_v2 = vld [vmem:[%s474_s4 + $0x28] sm:$0xff]  ;;  %v203_v5 = vld [vmem:[%s474_s4 + $0x18] sm:$0xff]  ;;  %s345_s0 = smov 8  }
   0xb   :  { %189 = vmatpush.msra.mxu1 %v165_v48  ;;  %225 = vmatpush.msra.mxu2 %v206_v1  ;;  %v204_v3 = vld [vmem:[%s474_s4 + $0x20] sm:$0xff] }
   0xc   :  { %86 = vmatpush.msra.mxu0 %v60_v9  ;;  %v49_v12 = vrot.slane %v48_v10, 2  ;;  %v56_v13 = vrot.slane %v55_v11, 2  ;;  %266 = vmatpush.msra.mxu3 %v206_v1 }
   0xd   :  { %v284_v38 = vpop.eup %283  ;;  %190 = vmatpush.msra.mxu1 %v164_v50  ;;  %226 = vmatpush.msra.mxu2 %v205_v2 }
   0xe   :  { %v50_v14 = vadd.f32 %v49_v12, %v48_v10  ;;  %v57_v15 = vadd.f32 %v56_v13, %v55_v11  ;;  %v108_v39 = vmul.f32 32.0, %v284_v38  ;;  %vm112_vm2 = vweird.f32 %v284_v38  ;;  %267 = vmatpush.msra.mxu3 %v205_v2 }
   0xf   :  { %227 = vmatpush.msra.mxu2 %v204_v3 }
  0x10   :  { %v51_v16 = vrot.slane %v50_v14, 1  ;;  %v58_v17 = vrot.slane %v57_v15, 1  ;;  %v109_v40 = vsub.f32 1.0, %v108_v39  ;;  %268 = vmatpush.msra.mxu3 %v204_v3  ;;  %v282_v39 = vld [vmem:[#allocation2 + $0x3] ss:$0 sm:$0xff] }
  0x11   :  { %228 = vmatpush.msra.mxu2 %v203_v5 }
  0x12   :  { %v52_v18 = vadd.f32 %v51_v16, %v50_v14  ;;  %v59_v19 = vadd.f32 %v58_v17, %v57_v15  ;;  %v110_v41 = vmul.f32 %v284_v38, %v109_v40  ;;  %269 = vmatpush.msra.mxu3 %v203_v5  ;;  %v279_v17 = vld [vmem:[#allocation2 + $0x1] ss:$0 sm:$0xff] }
  0x14   :  { %v68_v20 = vsel %vm67_vm1, %v59_v19, %v52_v18  ;;  %v111_v42 = vadd.f32 %v284_v38, %v110_v41 }
  0x15   :  { %260 = vmatmul.msk.f32.vlgmr.msra.gmra.mxu0 %vm45_vm0, %v68_v20 }
  0x16   :  { %v113_v45 = vsel %vm112_vm2, %v284_v38, %v111_v42 }
  0x92   :  { %v88_v22 = vpop.f32.mrf.mxu0 }
  0x93   :  { %v89_v23 = vadd.f32 %v278_v21, %v88_v22  ;;  %v280_v21 = vld [vmem:[#allocation2 + $0x2] ss:$0 sm:$0xff] }
  0x95   :  { %v94_v25 = vrot.slane %v89_v23, 1  ;;  %v95_v26 = vperm.slane %v89_v23, 0 }
  0x97   :  { %v96_v28 = vperm.slane %v94_v25, 0  ;;  %v411_v29 = vadd.f32 %v95_v26, %v91_v24 }
  0x99   :  { %v101_v30 = vsel %vm45_vm0, %v411_v29, 0.0  ;;  %v415_v31 = vadd.f32 %v96_v28, %v92_v27  ;;  %v116_v33 = vmul.f32 %v411_v29, %v411_v29 }
  0x9a   :  { %102 = vadd.xlane.f32.xlu0 %v101_v30  ;;  %v201_v30 = vld [vmem:[%s474_s4 + $0x8] sm:$0xff] }
  0x9b   :  { %v104_v32 = vsel %vm45_vm0, %v415_v31, 0.0  ;;  %v117_v34 = vmul.f32 %v415_v31, %v415_v31  ;;  %v118_v35 = vsel %vm45_vm0, %v116_v33, 0.0 }
  0x9c   :  { %105 = vadd.xlane.f32.xlu1 %v104_v32  ;;  %v281_v32 = vld [vmem:[#allocation2 + $0x4] ss:$0 sm:$0xff] }
  0x9d   :  { %v121_v36 = vsel %vm45_vm0, %v117_v34, 0.0 }
  0xa2   :  { %119 = vadd.xlane.f32.xlu0 %v118_v35 }
  0xa4   :  { %122 = vadd.xlane.f32.xlu1 %v121_v36 }
 0x10d   :  { %v103_v43 = vpop.xlane.xlu0 %102 }
 0x10e   :  { %v114_v49 = vmul.f32 %v113_v45, %v103_v43 }
 0x10f   :  { %v106_v46 = vpop.xlane.xlu1 %105 }
 0x110   :  { %v115_v51 = vmul.f32 %v113_v45, %v106_v46  ;;  %v126_v53 = vmul.f32 %v114_v49, %v114_v49  ;;  %v132_v16 = vsub.f32 %v411_v29, %v114_v49  ;;  %v202_v29 = vld [vmem:[%s474_s4 + $0x10] sm:$0xff] }
 0x111   :  { %229 = vmatpush.msra.mxu2 %v202_v29  ;;  %270 = vmatpush.msra.mxu3 %v202_v29 }
 0x112   :  { %v127_v56 = vmul.f32 %v115_v51, %v115_v51  ;;  %v133_v23 = vsub.f32 %v415_v31, %v115_v51  ;;  %v200_v31 = vld [vmem:[%s474_s4] sm:$0xff] }
 0x113   :  { %230 = vmatpush.msra.mxu2 %v201_v30  ;;  %271 = vmatpush.msra.mxu3 %v201_v30 }
 0x115   :  { %v120_v52 = vpop.xlane.xlu0 %119  ;;  %231 = vmatpush.msra.mxu2 %v200_v31  ;;  %272 = vmatpush.msra.mxu3 %v200_v31 }
 0x116   :  { %v124_v54 = vmul.f32 %v120_v52, %v113_v45 }
 0x117   :  { %v123_v55 = vpop.xlane.xlu1 %122 }
 0x118   :  { %v128_v57 = vsub.f32 %v124_v54, %v126_v53  ;;  %v125_v58 = vmul.f32 %v123_v55, %v113_v45 }
 0x11a   :  { %v130_v59 = vmax.f32 %v128_v57, 0.0  ;;  %v129_v60 = vsub.f32 %v125_v58, %v127_v56 }
 0x11c   :  { %v134_v61 = vadd.f32 1e-05, %v130_v59  ;;  %v131_v62 = vmax.f32 %v129_v60, 0.0 }
 0x11e   :  { %285 = vrsqrt.f32 %v134_v61  ;;  %v135_v63 = vadd.f32 1e-05, %v131_v62  ;;  %vm142_vm4 = vweird.f32 %v134_v61 }
 0x120   :  { %287 = vrsqrt.f32 %v135_v63  ;;  %vm152_vm7 = vweird.f32 %v135_v63 }
 0x124   :  { %v286_v4 = vpop.eup %285 }
 0x125   :  { %v137_v6 = vmul.f32 %v286_v4, %v134_v61  ;;  %vm143_vm3 = vweird.f32 %v286_v4 }
 0x126   :  { %v288_v7 = vpop.eup %287  ;;  %vm144_vm6 = vmor %vm142_vm4, %vm143_vm3 }
 0x127   :  { %v138_v8 = vmul.f32 %v286_v4, %v137_v6  ;;  %v147_v9 = vmul.f32 %v288_v7, %v135_v63  ;;  %vm153_vm5 = vweird.f32 %v288_v7 }
 0x128   :  { %vm154_vm8 = vmor %vm152_vm7, %vm153_vm5 }
 0x129   :  { %v139_v10 = vmul.f32 0.5, %v138_v8  ;;  %v148_v11 = vmul.f32 %v288_v7, %v147_v9 }
 0x12b   :  { %v140_v12 = vsub.f32 1.5, %v139_v10  ;;  %v149_v13 = vmul.f32 0.5, %v148_v11 }
 0x12d   :  { %v141_v14 = vmul.f32 %v286_v4, %v140_v12  ;;  %v150_v15 = vsub.f32 1.5, %v149_v13 }
 0x12f   :  { %v151_v18 = vmul.f32 %v288_v7, %v150_v15  ;;  %v145_v19 = vsel %vm144_vm6, %v286_v4, %v141_v14 }
 0x130   :  { %v156_v20 = vmul.f32 %v145_v19, %v132_v16 }
 0x131   :  { %v155_v22 = vsel %vm154_vm8, %v288_v7, %v151_v18 }
 0x132   :  { %v159_v24 = vmul.f32 %v279_v17, %v156_v20  ;;  %v157_v26 = vmul.f32 %v155_v22, %v133_v23 }
 0x134   :  { %v162_v25 = vadd.f32 %v280_v21, %v159_v24  ;;  %v160_v27 = vmul.f32 %v279_v17, %v157_v26 }
 0x136   :  { %261 = vmatmul.msk.f32.vlgmr.msra.gmra.mxu1 %vm45_vm0, %v162_v25  ;;  %v163_v28 = vadd.f32 %v280_v21, %v160_v27 }
 0x13e   :  { %262 = vmatmul.msk.f32.gmra.mxu1 %vm45_vm0, %v163_v28 }
 0x1b3   :  { %v192_v33 = vpop.f32.mrf.mxu1 }
 0x1b4   :  { %v193_v34 = vadd.f32 %v281_v32, %v192_v33 }
 0x1b6   :  { %v198_v35 = vmax.f32 %v193_v34, 0.0 }
 0x1b8   :  { %263 = vmatmul.msk.f32.vlgmr.msra.gmra.mxu2 %vm209_vm9, %v198_v35 }
 0x1bb   :  { %v195_v36 = vpop.f32.mrf.mxu1 }
 0x1bc   :  { %v196_v37 = vadd.f32 %v281_v32, %v195_v36 }
 0x1be   :  { %v199_v38 = vmax.f32 %v196_v37, 0.0 }
 0x1c0   :  { %264 = vmatmul.msk.f32.vlgmr.msra.gmra.mxu3 %vm209_vm9, %v199_v38 }
 0x23b   :  { %v233_v40 = vpop.f32.mrf.mxu2 }
 0x23c   :  { %v234_v41 = vadd.f32 %v282_v39, %v233_v40 }
 0x23e   :  { %239 = vst.msk [vmem:[#allocation5] sm:$0xff] %vm45_vm0, %v234_v41 }
 0x243   :  { %v236_v42 = vpop.f32.mrf.mxu3 }
 0x244   :  { %v237_v43 = vadd.f32 %v282_v39, %v236_v42 }
 0x246   :  { %240 = vst.msk [vmem:[#allocation5 + $0x8] sm:$0xff] %vm45_vm0, %v237_v43 }
 0x247   :  { %253 = dma.vmem_to_hbm [thread:$0]  %s246_s1, 256, %s248_s13, [#allocation4], %s344_s14, %s344_s14, %s345_s0  }
 0x248   :  { %339 = dma.done.wait [#allocation4], 256  }
 0x249   :  { %340 = vsyncadd [#allocation4], 4294967040 }
 0x24a   :  { %258 = vsyncpa [#allocation3], 1 }
 0x24b   :  { %259 = vsyncpa [#allocation4], 1 }

</bundles_post_ra>
